<compile_context>
chip_gen: v6e
topology: v6e:2x2x1
jax: 0.10.0
libtpu: 0.0.40
codegen_flags: <defaults>
</compile_context>

<pallas_src>
import functools
import math

import jax
import jax.numpy as jnp
from jax.experimental import pallas as pl
from jax.experimental.pallas import tpu as pltpu

# Module-level constants from the PyTorch spec.
d_k = 64
d_v = 64
d_model = 512
n_heads = 8
_LN_EPS = 1e-5  # PyTorch nn.LayerNorm default


# ---------------------------------------------------------------------------
# Kernel 1: bias-free linear, row-tiled. W arrives as [in, out] (transposed once
# in the wrapper) and stays VMEM-resident across the row grid.
# ---------------------------------------------------------------------------
def _linear_kernel(x_ref, w_ref, o_ref):
    o_ref[...] = jnp.dot(
        x_ref[...], w_ref[...], preferred_element_type=jnp.float32
    ).astype(o_ref.dtype)


def _linear(x2d, w_io, *, block_m=512):
    m, d_in = x2d.shape
    d_out = w_io.shape[1]
    tm = min(block_m, m)
    return pl.pallas_call(
        _linear_kernel,
        out_shape=jax.ShapeDtypeStruct((m, d_out), x2d.dtype),
        grid_spec=pltpu.PrefetchScalarGridSpec(
            num_scalar_prefetch=0,
            grid=(pl.cdiv(m, tm),),
            in_specs=[
                pl.BlockSpec((tm, d_in), lambda i: (i, 0)),
                pl.BlockSpec((d_in, d_out), lambda i: (0, 0)),   # weight resident
            ],
            out_specs=pl.BlockSpec((tm, d_out), lambda i: (i, 0)),
        ),
        compiler_params=pltpu.CompilerParams(
            dimension_semantics=("parallel",),
        ),
    )(x2d, w_io)


# ---------------------------------------------------------------------------
# Kernel 2: scaled dot-product attention; all heads of one batch element per
# grid step. Lane-dense (L, H*d) blocks; head split/merge in-kernel.
# ---------------------------------------------------------------------------
def _attention_kernel(q_ref, k_ref, v_ref, bias_ref, ctx_ref, attn_ref, *, scale):
    # Blocks: q (1, Lq, H*dk), k (1, Lk, H*dk), v (1, Lk, H*dv) lane-dense;
    #         bias (1, Lq, Lk) f32 additive mask (-1e9 at masked positions);
    #         ctx (1, Lq, H*dv) lane-dense; attn (1, H, Lq, Lk).
    bias = bias_ref[0]                                       # (Lq, Lk)
    for h in range(n_heads):                                 # static unroll over heads
        qh = q_ref[0, :, h * d_k:(h + 1) * d_k] * scale      # fold 1/sqrt(d_k) into Q
        kh = k_ref[0, :, h * d_k:(h + 1) * d_k]              # (Lk, dk)
        vh = v_ref[0, :, h * d_v:(h + 1) * d_v]              # (Lk, dv)

        # scores = Q @ K^T : contraction over d_k, no materialized transpose.
        s = jax.lax.dot_general(
            qh, kh, dimension_numbers=(((1,), (1,)), ((), ())),
            preferred_element_type=jnp.float32,
        )
        s = s + bias                                         # masked_fill as additive bias

        # numerically-stable softmax; denominator reciprocal on the EUP slot.
        s_max = jnp.max(s, axis=-1, keepdims=True)
        e = jnp.exp(s - s_max)
        denom = jnp.sum(e, axis=-1, keepdims=True)
        p = e * pl.reciprocal(denom, approx=True)

        attn_ref[0, h] = p.astype(attn_ref.dtype)
        ctx = jnp.dot(p.astype(vh.dtype), vh, preferred_element_type=jnp.float32)
        ctx_ref[0, :, h * d_v:(h + 1) * d_v] = ctx.astype(ctx_ref.dtype)


def scaled_dot_product_attention(q3, k3, v3, bias, *, attn_dtype=None):
    """q3:[B,Lq,H*dk]  k3:[B,Lk,H*dk]  v3:[B,Lk,H*dv]  bias:[B,Lq,Lk] f32 (-1e9 where masked)."""
    B, Lq, Dq = q3.shape
    Lk, Dv = k3.shape[1], v3.shape[2]
    attn_dtype = attn_dtype or q3.dtype   # bf16 here halves attn HBM writeback if desired

    kernel = functools.partial(_attention_kernel, scale=1.0 / math.sqrt(d_k))
    ctx, attn = pl.pallas_call(
        kernel,
        out_shape=(
            jax.ShapeDtypeStruct((B, Lq, Dv), q3.dtype),
            jax.ShapeDtypeStruct((B, n_heads, Lq, Lk), attn_dtype),
        ),
        grid_spec=pltpu.PrefetchScalarGridSpec(
            num_scalar_prefetch=0,
            grid=(B,),   # one step per batch element; all heads blocked (lane-dense)
            in_specs=[
                pl.BlockSpec((1, Lq, Dq), lambda b: (b, 0, 0)),
                pl.BlockSpec((1, Lk, Dq), lambda b: (b, 0, 0)),
                pl.BlockSpec((1, Lk, Dv), lambda b: (b, 0, 0)),
                pl.BlockSpec((1, Lq, Lk), lambda b: (b, 0, 0)),   # mask bias, once per batch
            ],
            out_specs=[
                pl.BlockSpec((1, Lq, Dv), lambda b: (b, 0, 0)),           # ctx, 512-lane dense
                pl.BlockSpec((1, n_heads, Lq, Lk), lambda b: (b, 0, 0, 0)),
            ],
        ),
        compiler_params=pltpu.CompilerParams(
            dimension_semantics=("parallel",),
            vmem_limit_bytes=32 * 1024 * 1024,   # v5e scoped default is only 16 MiB
        ),
    )(q3, k3, v3, bias)
    return ctx, attn


# ---------------------------------------------------------------------------
# Kernel 3: fc projection + residual + LayerNorm (fused), row-tiled.
# ---------------------------------------------------------------------------
def _out_proj_ln_kernel(ctx_ref, res_ref, w_ref, g_ref, b_ref, o_ref, *, eps):
    y = jnp.dot(ctx_ref[...], w_ref[...], preferred_element_type=jnp.float32)
    y = y + res_ref[...].astype(jnp.float32)                 # residual add
    mu = jnp.mean(y, axis=-1, keepdims=True)
    d = y - mu
    var = jnp.mean(d * d, axis=-1, keepdims=True)
    yn = d * jax.lax.rsqrt(var + eps)
    o_ref[...] = (yn * g_ref[...] + b_ref[...]).astype(o_ref.dtype)


def _out_proj_layernorm(ctx2d, res2d, w_fc_io, gamma, beta, *, block_m=512):
    m, d_in = ctx2d.shape
    d_out = w_fc_io.shape[1]
    tm = min(block_m, m)
    kernel = functools.partial(_out_proj_ln_kernel, eps=_LN_EPS)
    return pl.pallas_call(
        kernel,
        out_shape=jax.ShapeDtypeStruct((m, d_out), res2d.dtype),
        grid_spec=pltpu.PrefetchScalarGridSpec(
            num_scalar_prefetch=0,
            grid=(pl.cdiv(m, tm),),
            in_specs=[
                pl.BlockSpec((tm, d_in), lambda i: (i, 0)),      # ctx rows
                pl.BlockSpec((tm, d_out), lambda i: (i, 0)),     # residual rows
                pl.BlockSpec((d_in, d_out), lambda i: (0, 0)),   # W_fc resident
                pl.BlockSpec((1, d_out), lambda i: (0, 0)),      # gamma resident
                pl.BlockSpec((1, d_out), lambda i: (0, 0)),      # beta resident
            ],
            out_specs=pl.BlockSpec((tm, d_out), lambda i: (i, 0)),
        ),
        compiler_params=pltpu.CompilerParams(
            dimension_semantics=("parallel",),
        ),
    )(ctx2d, res2d, w_fc_io, gamma.reshape(1, -1), beta.reshape(1, -1))


# ---------------------------------------------------------------------------
# Full MultiHeadAttention forward
# ---------------------------------------------------------------------------
def multi_head_attention(input_Q, input_K, input_V, attn_mask,
                         w_q, w_fc, ln_gamma, ln_beta):
    """input_Q/K/V: [B, L, d_model]; attn_mask: [B, Lq, Lk] bool (True => masked).
    w_q: [n_heads*d_k, d_model], w_fc: [d_model, n_heads*d_v] (PyTorch [out, in])."""
    B, Lq, _ = input_Q.shape
    Lk = input_K.shape[1]

    # One-time wrapper transposes to [in, out]: the in-kernel matmul is a plain
    # contraction (no hidden per-tile transpose) with the weight VMEM-resident.
    w_q_io = jnp.transpose(w_q)     # [d_model, n_heads*d_k]
    w_fc_io = jnp.transpose(w_fc)   # [n_heads*d_v, d_model]

    # The reference module applies W_Q to Q, K and V. Self-attention fast path:
    # if K/V alias Q, project once and reuse (3x fewer projection FLOPs + DMA).
    q3 = _linear(input_Q.reshape(B * Lq, d_model), w_q_io).reshape(B, Lq, n_heads * d_k)
    if input_K is input_Q:
        k3 = q3
    else:
        k3 = _linear(input_K.reshape(B * Lk, d_model), w_q_io).reshape(B, Lk, n_heads * d_k)
    if input_V is input_Q:
        v3 = q3
    elif input_V is input_K:
        v3 = k3
    else:
        v3 = _linear(input_V.reshape(B * Lk, d_model), w_q_io).reshape(B, Lk, n_heads * d_v)

    # masked_fill(-1e9) as an additive bias (single VPU add in-kernel instead of
    # cast + compare + select); broadcast over heads inside the kernel.
    bias = attn_mask.astype(jnp.float32) * jnp.float32(-1e9)   # [B, Lq, Lk]

    # Lane-dense (L, H*d) blocks in/out: head split/merge happens inside the kernel,
    # so there are NO [B, L, H, d] wrapper transposes (HBM round trips).
    ctx3, attn4 = scaled_dot_product_attention(q3, k3, v3, bias)

    # TODO(synk): for long sequences where callers drop the attn output, switch to a
    # flash-style Lk-tiled online-softmax grid instead of materializing (H, Lq, Lk).
    out2d = _out_proj_layernorm(
        ctx3.reshape(B * Lq, n_heads * d_v),
        input_Q.reshape(B * Lq, d_model),
        w_fc_io, ln_gamma, ln_beta,
    )
    return out2d.reshape(B, Lq, d_model), attn4


# ---------------------------------------------------------------------------
# Pure-JAX reference (matches the PyTorch forward, incl. W_Q used for K and V)
# ---------------------------------------------------------------------------
def _reference_mha(input_Q, input_K, input_V, attn_mask, w_q, w_fc, gamma, beta):
    B, Lq, _ = input_Q.shape
    Lk = input_K.shape[1]
    Q = (input_Q @ w_q.T).reshape(B, Lq, n_heads, d_k).transpose(0, 2, 1, 3)
    K = (input_K @ w_q.T).reshape(B, Lk, n_heads, d_k).transpose(0, 2, 1, 3)
    V = (input_V @ w_q.T).reshape(B, Lk, n_heads, d_k).transpose(0, 2, 1, 3)
    mask = jnp.broadcast_to(attn_mask[:, None], (B, n_heads, Lq, Lk))
    scores = jnp.einsum("bhqd,bhkd->bhqk", Q, K) / math.sqrt(d_k)
    scores = jnp.where(mask, jnp.float32(-1e9), scores)
    attn = jax.nn.softmax(scores, axis=-1)
    ctx = jnp.einsum("bhqk,bhkd->bhqd", attn, V)
    ctx = ctx.transpose(0, 2, 1, 3).reshape(B, Lq, n_heads * d_v)
    y = ctx @ w_fc.T + input_Q
    mu = y.mean(-1, keepdims=True)
    var = ((y - mu) ** 2).mean(-1, keepdims=True)
    out = (y - mu) / jnp.sqrt(var + _LN_EPS) * gamma + beta
    return out, attn


if __name__ == "__main__":
    B, L = 2, 8  # small batch/seq; d_model=512, n_heads=8, d_k=d_v=64 fixed by the module

    key = jax.random.PRNGKey(0)
    kx, km, kwq, kwf = jax.random.split(key, 4)

    x = jax.random.normal(kx, (B, L, d_model), dtype=jnp.float32)
    attn_mask = jax.random.bernoulli(km, p=0.25, shape=(B, L, L))  # True => masked
    # Keep key position 0 visible so no row is fully masked (degenerate case).
    attn_mask = attn_mask.at[:, :, 0].set(False)
    w_q = jax.random.normal(kwq, (n_heads * d_k, d_model), dtype=jnp.float32) * 0.03
    w_fc = jax.random.normal(kwf, (d_model, n_heads * d_v), dtype=jnp.float32) * 0.03
    ln_gamma = jnp.ones((d_model,), jnp.float32)   # PyTorch LayerNorm init
    ln_beta = jnp.zeros((d_model,), jnp.float32)

    out, attn = multi_head_attention(x, x, x, attn_mask, w_q, w_fc, ln_gamma, ln_beta)
    jax.block_until_ready((out, attn))

    out_ref, attn_ref = _reference_mha(x, x, x, attn_mask, w_q, w_fc, ln_gamma, ln_beta)

    assert out.shape == (B, L, d_model) and attn.shape == (B, n_heads, L, L)
    # Tolerances loosened slightly for the EUP approx-reciprocal softmax denominator.
    assert jnp.allclose(attn, attn_ref, atol=2e-3, rtol=1e-2), float(
        jnp.max(jnp.abs(attn - attn_ref)))
    assert jnp.allclose(out, out_ref, atol=5e-3, rtol=1e-2), float(
        jnp.max(jnp.abs(out - out_ref)))

    print("KERNEL_OK")
</pallas_src>

<mosaic_0001>
module attributes {stable_mosaic.version = 11 : i64} {
  func.func @_linear_kernel(%arg0: i32, %arg1: memref<16x512xf32, #tpu.memory_space<vmem>>, %arg2: memref<512x512xf32, #tpu.memory_space<vmem>>, %arg3: memref<16x512xf32, #tpu.memory_space<vmem>>) attributes {dimension_semantics = [#tpu.dimension_semantics<parallel>], iteration_bounds = array<i64: 1>, scalar_prefetch = 0 : i64, scratch_operands = 0 : i64, tpu.core_type = #tpu.core_type<tc>, window_params = [{transform_indices = @transform_0, window_bounds = array<i64: 16, 512>}, {pipeline_mode = #tpu.pipeline_mode<synchronous>, transform_indices = @transform_1, window_bounds = array<i64: 512, 512>}, {transform_indices = @transform_2, window_bounds = array<i64: 16, 512>}]} {
    %c0 = arith.constant 0 : index
    %c0_0 = arith.constant 0 : index
    %0 = vector.load %arg1[%c0, %c0_0] : memref<16x512xf32, #tpu.memory_space<vmem>>, vector<16x512xf32>
    %c0_1 = arith.constant 0 : index
    %c0_2 = arith.constant 0 : index
    %1 = vector.load %arg2[%c0_1, %c0_2] : memref<512x512xf32, #tpu.memory_space<vmem>>, vector<512x512xf32>
    %cst = arith.constant dense<0.000000e+00> : vector<16x512xf32>
    %2 = tpu.matmul %0, %1, %cst {dimension_numbers = #tpu.dot_dimension_numbers<[1], [0], [0], [1], [0, 0, 1, 1], [], []>} : vector<16x512xf32>, vector<512x512xf32>, vector<16x512xf32> -> vector<16x512xf32>
    %c0_3 = arith.constant 0 : index
    %c0_4 = arith.constant 0 : index
    %3 = vector.load %arg3[%c0_3, %c0_4] : memref<16x512xf32, #tpu.memory_space<vmem>>, vector<16x512xf32>
    tpu.vector_store %arg3[%c0_3, %c0_4], %2 {strides = array<i32>} : memref<16x512xf32, #tpu.memory_space<vmem>>, vector<16x512xf32>,
    return
  }
  func.func @transform_0(%arg0: i32) -> (i32, i32) {
    %c0_i32 = arith.constant 0 : i32
    %c0_i32_0 = arith.constant 0 : i32
    return %arg0, %c0_i32 : i32, i32
  }
  func.func @transform_1(%arg0: i32) -> (i32, i32) {
    %c0_i32 = arith.constant 0 : i32
    %c0_i32_0 = arith.constant 0 : i32
    %c0_i32_1 = arith.constant 0 : i32
    return %c0_i32, %c0_i32_0 : i32, i32
  }
  func.func @transform_2(%arg0: i32) -> (i32, i32) {
    %c0_i32 = arith.constant 0 : i32
    %c0_i32_0 = arith.constant 0 : i32
    return %arg0, %c0_i32 : i32, i32
  }
}

</mosaic_0001>

<bundles_post_ra>
// kernel: tpu_custom_call.1
= control target key start
LH: loop header
LB: loop body
LE: loop exit
PB: predicated region body
PF: predicated region fallthrough
CT: control target
= control target key end

     0   :  { %7 = vsyncpa [#allocation3], 0  ;;  %s763_s0 = inlined_call_operand.hbm [shape: f32[16,512], index: 0, kind: input, shape index: {}]   ;;  %s764_s1 = inlined_call_operand.hbm [shape: f32[512,512], index: 1, kind: input, shape index: {}]   ;;  %s765_s2 = inlined_call_operand.hbm [shape: f32[16,512], index: 2, kind: output, shape index: {}]  }
   0x1   :  { %8 = vsyncpa [#allocation6], 0 }
   0x2   :  { %9 = vsyncpa [#allocation4], 0  ;;  %s709_s9 = smov [#allocation2]  }
   0x3   :  { %s15_s10 = sshll.u32 %s709_s9, 4  ;;  %s16_s10 = int_to_ptr.vmem [resolvable:$true] %s15_s10 }
   0x4   :  { %s651_s11 = scalar_lea.vmem %s16_s10, 1024  ;;  %p656_p1 = scmp.lt.s32.totalorder %s16_s10, %s16_s10 }
   0x5   :  { %p652_p0 = scmp.ne.s32.totalorder %s16_s10, %s651_s11  ;;  %p657_p2 = scmp.lt.s32.totalorder %s651_s11, %s651_s11 }
   0x7   :  { %p658_p3 = por %p657_p2, %p656_p1 }
   0x9   :  { %p659_p4 = pnand %p658_p3, %p652_p0 }
   0xb   :  { %662 = shalt.err (!%p659_p4)
}
   0xc   :  { %s710_s12 = smov 512   ;;  %s711_s13 = smov 32  }
   0xd   :  { %21 = dma.hbm_to_vmem [thread:$0]  %s763_s0, 1024, %s16_s10, [#allocation3], %s710_s12, %s710_s12, %s711_s13  }
   0xe   :  { %s712_s16 = smov [#allocation5]  }
   0xf   :  { %s27_s17 = sshll.u32 %s712_s16, 4  ;;  %s28_s17 = int_to_ptr.vmem [resolvable:$true] %s27_s17 }
  0x10   :  { %s671_s18 = scalar_lea.vmem %s28_s17, 32768  ;;  %p676_p6 = scmp.lt.s32.totalorder %s28_s17, %s28_s17 }
  0x11   :  { %p672_p5 = scmp.ne.s32.totalorder %s28_s17, %s671_s18  ;;  %p677_p7 = scmp.lt.s32.totalorder %s671_s18, %s671_s18 }
  0x13   :  { %p678_p8 = por %p677_p7, %p676_p6 }
  0x15   :  { %p679_p9 = pnand %p678_p8, %p672_p5 }
  0x17   :  { %682 = shalt.err (!%p679_p9)
}
  0x18   :  { %33 = dma.hbm_to_vmem [thread:$0]  %s764_s1, 32768, %s28_s17, [#allocation6], %s710_s12, %s710_s12, %s711_s13  }
  0x19   :  { %703 = dma.done.wait [#allocation3], 1024  }
  0x1a   :  { %704 = vsyncadd [#allocation3], 4294966272 }
  0x1b   :  { %705 = dma.done.wait [#allocation6], 32768  }
  0x1c   :  { %706 = vsyncadd [#allocation6], 4294934528  ;;  %v109_v0 = vld [vmem:[#allocation5 + $0x1e8] sm:$0xff]  ;;  %v108_v2 = vld [vmem:[#allocation5 + $0x1e0] sm:$0xff]  ;;  %s713_s0 = smov [#allocation7]  }
  0x1d   :  { %v237_v1 = vld [vmem:[#allocation5 + $0x5e8] sm:$0xff]  ;;  %304 = vmatprep.subr.mxu0 %v109_v0  ;;  %v236_v3 = vld [vmem:[#allocation5 + $0x5e0] sm:$0xff]  ;;  %s625_s1 = sshll.u32 %s713_s0, 4  ;;  %s626_s1 = int_to_ptr.vmem [resolvable:$true] %s625_s1 }
  0x1e   :  { %381 = vmatprep.subr.mxu1 %v237_v1  ;;  %v105_v4 = vld [vmem:[#allocation5 + $0x1c8] sm:$0xff]  ;;  %305 = vmatpush1.msra.mxu0 %v108_v2  ;;  %v104_v6 = vld [vmem:[#allocation5 + $0x1c0] sm:$0xff]  ;;  %s683_s21 = scalar_lea.vmem %s626_s1, 1024  ;;  %p688_p11 = scmp.lt.s32.totalorder %s626_s1, %s626_s1 }
  0x1f   :  { %v233_v5 = vld [vmem:[#allocation5 + $0x5c8] sm:$0xff]  ;;  %382 = vmatpush1.msra.mxu1 %v236_v3  ;;  %v232_v7 = vld [vmem:[#allocation5 + $0x5c0] sm:$0xff]  ;;  %306 = vmatprep.subr.mxu0 %v105_v4  ;;  %p684_p10 = scmp.ne.s32.totalorder %s626_s1, %s683_s21  ;;  %p689_p12 = scmp.lt.s32.totalorder %s683_s21, %s683_s21 }
  0x20   :  { %v101_v8 = vld [vmem:[#allocation5 + $0x1a8] sm:$0xff]  ;;  %383 = vmatprep.subr.mxu1 %v233_v5  ;;  %v100_v10 = vld [vmem:[#allocation5 + $0x1a0] sm:$0xff]  ;;  %307 = vmatpush1.msra.mxu0 %v104_v6 }
  0x21   :  { %v229_v9 = vld [vmem:[#allocation5 + $0x5a8] sm:$0xff]  ;;  %v228_v11 = vld [vmem:[#allocation5 + $0x5a0] sm:$0xff]  ;;  %384 = vmatpush1.msra.mxu1 %v232_v7  ;;  %308 = vmatprep.subr.mxu0 %v101_v8  ;;  %p690_p13 = por %p689_p12, %p688_p11 }
  0x22   :  { %v97_v12 = vld [vmem:[#allocation5 + $0x188] sm:$0xff]  ;;  %385 = vmatprep.subr.mxu1 %v229_v9  ;;  %v96_v14 = vld [vmem:[#allocation5 + $0x180] sm:$0xff]  ;;  %309 = vmatpush1.msra.mxu0 %v100_v10 }
  0x23   :  { %v225_v13 = vld [vmem:[#allocation5 + $0x588] sm:$0xff]  ;;  %v224_v15 = vld [vmem:[#allocation5 + $0x580] sm:$0xff]  ;;  %386 = vmatpush1.msra.mxu1 %v228_v11  ;;  %310 = vmatprep.subr.mxu0 %v97_v12  ;;  %p691_p0 = pnand %p690_p13, %p684_p10 }
  0x24   :  { %v93_v16 = vld [vmem:[#allocation5 + $0x168] sm:$0xff]  ;;  %387 = vmatprep.subr.mxu1 %v225_v13  ;;  %v92_v18 = vld [vmem:[#allocation5 + $0x160] sm:$0xff]  ;;  %311 = vmatpush1.msra.mxu0 %v96_v14 }
  0x25   :  { %v221_v17 = vld [vmem:[#allocation5 + $0x568] sm:$0xff]  ;;  %v220_v19 = vld [vmem:[#allocation5 + $0x560] sm:$0xff]  ;;  %388 = vmatpush1.msra.mxu1 %v224_v15  ;;  %312 = vmatprep.subr.mxu0 %v93_v16 }
  0x26   :  { %v89_v20 = vld [vmem:[#allocation5 + $0x148] sm:$0xff]  ;;  %389 = vmatprep.subr.mxu1 %v221_v17  ;;  %v88_v22 = vld [vmem:[#allocation5 + $0x140] sm:$0xff]  ;;  %313 = vmatpush1.msra.mxu0 %v92_v18 }
  0x27   :  { %v217_v21 = vld [vmem:[#allocation5 + $0x548] sm:$0xff]  ;;  %v216_v23 = vld [vmem:[#allocation5 + $0x540] sm:$0xff]  ;;  %390 = vmatpush1.msra.mxu1 %v220_v19  ;;  %314 = vmatprep.subr.mxu0 %v89_v20 }
  0x28   :  { %v85_v24 = vld [vmem:[#allocation5 + $0x128] sm:$0xff]  ;;  %391 = vmatprep.subr.mxu1 %v217_v21  ;;  %v84_v26 = vld [vmem:[#allocation5 + $0x120] sm:$0xff]  ;;  %315 = vmatpush1.msra.mxu0 %v88_v22 }
  0x29   :  { %v213_v25 = vld [vmem:[#allocation5 + $0x528] sm:$0xff]  ;;  %v212_v27 = vld [vmem:[#allocation5 + $0x520] sm:$0xff]  ;;  %392 = vmatpush1.msra.mxu1 %v216_v23  ;;  %316 = vmatprep.subr.mxu0 %v85_v24 }
  0x2a   :  { %v81_v28 = vld [vmem:[#allocation5 + $0x108] sm:$0xff]  ;;  %393 = vmatprep.subr.mxu1 %v213_v25  ;;  %v80_v30 = vld [vmem:[#allocation5 + $0x100] sm:$0xff]  ;;  %317 = vmatpush1.msra.mxu0 %v84_v26 }
  0x2b   :  { %v209_v29 = vld [vmem:[#allocation5 + $0x508] sm:$0xff]  ;;  %v208_v31 = vld [vmem:[#allocation5 + $0x500] sm:$0xff]  ;;  %394 = vmatpush1.msra.mxu1 %v212_v27  ;;  %318 = vmatprep.subr.mxu0 %v81_v28 }
  0x2c   :  { %v77_v32 = vld [vmem:[#allocation5 + $0xe8] sm:$0xff]  ;;  %395 = vmatprep.subr.mxu1 %v209_v29  ;;  %v76_v34 = vld [vmem:[#allocation5 + $0xe0] sm:$0xff]  ;;  %319 = vmatpush1.msra.mxu0 %v80_v30 }
  0x2d   :  { %v205_v33 = vld [vmem:[#allocation5 + $0x4e8] sm:$0xff]  ;;  %v204_v35 = vld [vmem:[#allocation5 + $0x4e0] sm:$0xff]  ;;  %396 = vmatpush1.msra.mxu1 %v208_v31  ;;  %320 = vmatprep.subr.mxu0 %v77_v32 }
  0x2e   :  { %v73_v36 = vld [vmem:[#allocation5 + $0xc8] sm:$0xff]  ;;  %397 = vmatprep.subr.mxu1 %v205_v33  ;;  %v72_v38 = vld [vmem:[#allocation5 + $0xc0] sm:$0xff]  ;;  %321 = vmatpush1.msra.mxu0 %v76_v34 }
  0x2f   :  { %v201_v37 = vld [vmem:[#allocation5 + $0x4c8] sm:$0xff]  ;;  %v200_v39 = vld [vmem:[#allocation5 + $0x4c0] sm:$0xff]  ;;  %398 = vmatpush1.msra.mxu1 %v204_v35  ;;  %322 = vmatprep.subr.mxu0 %v73_v36 }
  0x30   :  { %v69_v40 = vld [vmem:[#allocation5 + $0xa8] sm:$0xff]  ;;  %399 = vmatprep.subr.mxu1 %v201_v37  ;;  %v68_v42 = vld [vmem:[#allocation5 + $0xa0] sm:$0xff]  ;;  %323 = vmatpush1.msra.mxu0 %v72_v38 }
  0x31   :  { %v197_v41 = vld [vmem:[#allocation5 + $0x4a8] sm:$0xff]  ;;  %v196_v43 = vld [vmem:[#allocation5 + $0x4a0] sm:$0xff]  ;;  %400 = vmatpush1.msra.mxu1 %v200_v39  ;;  %324 = vmatprep.subr.mxu0 %v69_v40 }
  0x32   :  { %v65_v44 = vld [vmem:[#allocation5 + $0x88] sm:$0xff]  ;;  %401 = vmatprep.subr.mxu1 %v197_v41  ;;  %v64_v46 = vld [vmem:[#allocation5 + $0x80] sm:$0xff]  ;;  %325 = vmatpush1.msra.mxu0 %v68_v42 }
  0x33   :  { %v193_v45 = vld [vmem:[#allocation5 + $0x488] sm:$0xff]  ;;  %v192_v47 = vld [vmem:[#allocation5 + $0x480] sm:$0xff]  ;;  %402 = vmatpush1.msra.mxu1 %v196_v43  ;;  %326 = vmatprep.subr.mxu0 %v65_v44 }
  0x34   :  { %v61_v48 = vld [vmem:[#allocation5 + $0x68] sm:$0xff]  ;;  %403 = vmatprep.subr.mxu1 %v193_v45  ;;  %v60_v50 = vld [vmem:[#allocation5 + $0x60] sm:$0xff]  ;;  %327 = vmatpush1.msra.mxu0 %v64_v46 }
  0x35   :  { %v189_v49 = vld [vmem:[#allocation5 + $0x468] sm:$0xff]  ;;  %v188_v51 = vld [vmem:[#allocation5 + $0x460] sm:$0xff]  ;;  %404 = vmatpush1.msra.mxu1 %v192_v47  ;;  %328 = vmatprep.subr.mxu0 %v61_v48 }
  0x36   :  { %v57_v52 = vld [vmem:[#allocation5 + $0x48] sm:$0xff]  ;;  %405 = vmatprep.subr.mxu1 %v189_v49  ;;  %v56_v54 = vld [vmem:[#allocation5 + $0x40] sm:$0xff]  ;;  %329 = vmatpush1.msra.mxu0 %v60_v50 }
  0x37   :  { %v185_v53 = vld [vmem:[#allocation5 + $0x448] sm:$0xff]  ;;  %v184_v55 = vld [vmem:[#allocation5 + $0x440] sm:$0xff]  ;;  %406 = vmatpush1.msra.mxu1 %v188_v51  ;;  %330 = vmatprep.subr.mxu0 %v57_v52 }
  0x38   :  { %v53_v56 = vld [vmem:[#allocation5 + $0x28] sm:$0xff]  ;;  %407 = vmatprep.subr.mxu1 %v185_v53  ;;  %v52_v58 = vld [vmem:[#allocation5 + $0x20] sm:$0xff]  ;;  %331 = vmatpush1.msra.mxu0 %v56_v54 }
  0x39   :  { %v181_v57 = vld [vmem:[#allocation5 + $0x428] sm:$0xff]  ;;  %v180_v59 = vld [vmem:[#allocation5 + $0x420] sm:$0xff]  ;;  %408 = vmatpush1.msra.mxu1 %v184_v55  ;;  %332 = vmatprep.subr.mxu0 %v53_v56 }
  0x3a   :  { %v49_v60 = vld [vmem:[#allocation5 + $0x8] sm:$0xff]  ;;  %409 = vmatprep.subr.mxu1 %v181_v57  ;;  %v48_v62 = vld [vmem:[#allocation5] sm:$0xff]  ;;  %333 = vmatpush1.msra.mxu0 %v52_v58 }
  0x3b   :  { %v177_v61 = vld [vmem:[#allocation5 + $0x408] sm:$0xff]  ;;  %v176_v63 = vld [vmem:[#allocation5 + $0x400] sm:$0xff]  ;;  %410 = vmatpush1.msra.mxu1 %v180_v59  ;;  %334 = vmatprep.subr.mxu0 %v49_v60 }
  0x3c   :  { %v173_v0 = vld [vmem:[#allocation5 + $0x3e8] sm:$0xff]  ;;  %411 = vmatprep.subr.mxu1 %v177_v61  ;;  %v172_v2 = vld [vmem:[#allocation5 + $0x3e0] sm:$0xff]  ;;  %335 = vmatpush1.msra.mxu0 %v48_v62 }
  0x3d   :  { %v301_v1 = vld [vmem:[#allocation5 + $0x7e8] sm:$0xff]  ;;  %v300_v3 = vld [vmem:[#allocation5 + $0x7e0] sm:$0xff]  ;;  %412 = vmatpush1.msra.mxu1 %v176_v63  ;;  %336 = vmatprep.subr.mxu0 %v173_v0 }
  0x3e   :  { %v169_v4 = vld [vmem:[#allocation5 + $0x3c8] sm:$0xff]  ;;  %413 = vmatprep.subr.mxu1 %v301_v1  ;;  %v168_v6 = vld [vmem:[#allocation5 + $0x3c0] sm:$0xff]  ;;  %337 = vmatpush2.msra.mxu0 %v172_v2  ;;  %v743_v1 = vld [vmem:[#allocation2 + $0x18] sm:$0xff] }
  0x3f   :  { %v297_v5 = vld [vmem:[#allocation5 + $0x7c8] sm:$0xff]  ;;  %v296_v7 = vld [vmem:[#allocation5 + $0x7c0] sm:$0xff]  ;;  %414 = vmatpush2.msra.mxu1 %v300_v3  ;;  %338 = vmatprep.subr.mxu0 %v169_v4  ;;  %v747_v3 = vld [vmem:[#allocation2 + $0x10] sm:$0xff] }
  0x40   :  { %v165_v8 = vld [vmem:[#allocation5 + $0x3a8] sm:$0xff]  ;;  %415 = vmatprep.subr.mxu1 %v297_v5  ;;  %v164_v10 = vld [vmem:[#allocation5 + $0x3a0] sm:$0xff]  ;;  %339 = vmatpush2.msra.mxu0 %v168_v6  ;;  %v111_v4 = vld [vmem:[#allocation5 + $0x1f8] sm:$0xff] }
  0x41   :  { %v293_v9 = vld [vmem:[#allocation5 + $0x7a8] sm:$0xff]  ;;  %v292_v11 = vld [vmem:[#allocation5 + $0x7a0] sm:$0xff]  ;;  %416 = vmatpush2.msra.mxu1 %v296_v7  ;;  %340 = vmatprep.subr.mxu0 %v165_v8  ;;  %v239_v5 = vld [vmem:[#allocation5 + $0x5f8] sm:$0xff] }
  0x42   :  { %v161_v12 = vld [vmem:[#allocation5 + $0x388] sm:$0xff]  ;;  %417 = vmatprep.subr.mxu1 %v293_v9  ;;  %v160_v14 = vld [vmem:[#allocation5 + $0x380] sm:$0xff]  ;;  %341 = vmatpush2.msra.mxu0 %v164_v10  ;;  %v110_v6 = vld [vmem:[#allocation5 + $0x1f0] sm:$0xff] }
  0x43   :  { %v289_v13 = vld [vmem:[#allocation5 + $0x788] sm:$0xff]  ;;  %v288_v15 = vld [vmem:[#allocation5 + $0x780] sm:$0xff]  ;;  %418 = vmatpush2.msra.mxu1 %v292_v11  ;;  %342 = vmatprep.subr.mxu0 %v161_v12  ;;  %v238_v7 = vld [vmem:[#allocation5 + $0x5f0] sm:$0xff] }
  0x44   :  { %v157_v16 = vld [vmem:[#allocation5 + $0x368] sm:$0xff]  ;;  %419 = vmatprep.subr.mxu1 %v289_v13  ;;  %v156_v18 = vld [vmem:[#allocation5 + $0x360] sm:$0xff]  ;;  %343 = vmatpush2.msra.mxu0 %v160_v14  ;;  %v107_v8 = vld [vmem:[#allocation5 + $0x1d8] sm:$0xff] }
  0x45   :  { %v285_v17 = vld [vmem:[#allocation5 + $0x768] sm:$0xff]  ;;  %v284_v19 = vld [vmem:[#allocation5 + $0x760] sm:$0xff]  ;;  %420 = vmatpush2.msra.mxu1 %v288_v15  ;;  %344 = vmatprep.subr.mxu0 %v157_v16  ;;  %v235_v9 = vld [vmem:[#allocation5 + $0x5d8] sm:$0xff] }
  0x46   :  { %v153_v20 = vld [vmem:[#allocation5 + $0x348] sm:$0xff]  ;;  %421 = vmatprep.subr.mxu1 %v285_v17  ;;  %v152_v22 = vld [vmem:[#allocation5 + $0x340] sm:$0xff]  ;;  %345 = vmatpush2.msra.mxu0 %v156_v18  ;;  %v106_v10 = vld [vmem:[#allocation5 + $0x1d0] sm:$0xff] }
  0x47   :  { %v281_v21 = vld [vmem:[#allocation5 + $0x748] sm:$0xff]  ;;  %v280_v23 = vld [vmem:[#allocation5 + $0x740] sm:$0xff]  ;;  %422 = vmatpush2.msra.mxu1 %v284_v19  ;;  %346 = vmatprep.subr.mxu0 %v153_v20  ;;  %v234_v11 = vld [vmem:[#allocation5 + $0x5d0] sm:$0xff] }
  0x48   :  { %v149_v24 = vld [vmem:[#allocation5 + $0x328] sm:$0xff]  ;;  %423 = vmatprep.subr.mxu1 %v281_v21  ;;  %v148_v26 = vld [vmem:[#allocation5 + $0x320] sm:$0xff]  ;;  %347 = vmatpush2.msra.mxu0 %v152_v22  ;;  %v103_v12 = vld [vmem:[#allocation5 + $0x1b8] sm:$0xff] }
  0x49   :  { %v277_v25 = vld [vmem:[#allocation5 + $0x728] sm:$0xff]  ;;  %v276_v27 = vld [vmem:[#allocation5 + $0x720] sm:$0xff]  ;;  %424 = vmatpush2.msra.mxu1 %v280_v23  ;;  %348 = vmatprep.subr.mxu0 %v149_v24  ;;  %v231_v13 = vld [vmem:[#allocation5 + $0x5b8] sm:$0xff] }
  0x4a   :  { %v145_v28 = vld [vmem:[#allocation5 + $0x308] sm:$0xff]  ;;  %425 = vmatprep.subr.mxu1 %v277_v25  ;;  %v144_v30 = vld [vmem:[#allocation5 + $0x300] sm:$0xff]  ;;  %349 = vmatpush2.msra.mxu0 %v148_v26  ;;  %v102_v14 = vld [vmem:[#allocation5 + $0x1b0] sm:$0xff] }
  0x4b   :  { %v273_v29 = vld [vmem:[#allocation5 + $0x708] sm:$0xff]  ;;  %v272_v31 = vld [vmem:[#allocation5 + $0x700] sm:$0xff]  ;;  %426 = vmatpush2.msra.mxu1 %v276_v27  ;;  %350 = vmatprep.subr.mxu0 %v145_v28  ;;  %v230_v15 = vld [vmem:[#allocation5 + $0x5b0] sm:$0xff] }
  0x4c   :  { %v141_v32 = vld [vmem:[#allocation5 + $0x2e8] sm:$0xff]  ;;  %427 = vmatprep.subr.mxu1 %v273_v29  ;;  %v140_v34 = vld [vmem:[#allocation5 + $0x2e0] sm:$0xff]  ;;  %351 = vmatpush2.msra.mxu0 %v144_v30  ;;  %v99_v16 = vld [vmem:[#allocation5 + $0x198] sm:$0xff] }
  0x4d   :  { %v269_v33 = vld [vmem:[#allocation5 + $0x6e8] sm:$0xff]  ;;  %v268_v35 = vld [vmem:[#allocation5 + $0x6e0] sm:$0xff]  ;;  %428 = vmatpush2.msra.mxu1 %v272_v31  ;;  %352 = vmatprep.subr.mxu0 %v141_v32  ;;  %v227_v17 = vld [vmem:[#allocation5 + $0x598] sm:$0xff] }
  0x4e   :  { %v137_v36 = vld [vmem:[#allocation5 + $0x2c8] sm:$0xff]  ;;  %429 = vmatprep.subr.mxu1 %v269_v33  ;;  %v136_v38 = vld [vmem:[#allocation5 + $0x2c0] sm:$0xff]  ;;  %353 = vmatpush2.msra.mxu0 %v140_v34  ;;  %v98_v18 = vld [vmem:[#allocation5 + $0x190] sm:$0xff] }
  0x4f   :  { %v265_v37 = vld [vmem:[#allocation5 + $0x6c8] sm:$0xff]  ;;  %v264_v39 = vld [vmem:[#allocation5 + $0x6c0] sm:$0xff]  ;;  %430 = vmatpush2.msra.mxu1 %v268_v35  ;;  %354 = vmatprep.subr.mxu0 %v137_v36  ;;  %v226_v19 = vld [vmem:[#allocation5 + $0x590] sm:$0xff] }
  0x50   :  { %v133_v40 = vld [vmem:[#allocation5 + $0x2a8] sm:$0xff]  ;;  %431 = vmatprep.subr.mxu1 %v265_v37  ;;  %v132_v42 = vld [vmem:[#allocation5 + $0x2a0] sm:$0xff]  ;;  %355 = vmatpush2.msra.mxu0 %v136_v38  ;;  %v95_v20 = vld [vmem:[#allocation5 + $0x178] sm:$0xff] }
  0x51   :  { %v261_v41 = vld [vmem:[#allocation5 + $0x6a8] sm:$0xff]  ;;  %v260_v43 = vld [vmem:[#allocation5 + $0x6a0] sm:$0xff]  ;;  %432 = vmatpush2.msra.mxu1 %v264_v39  ;;  %356 = vmatprep.subr.mxu0 %v133_v40  ;;  %v223_v21 = vld [vmem:[#allocation5 + $0x578] sm:$0xff] }
  0x52   :  { %v129_v44 = vld [vmem:[#allocation5 + $0x288] sm:$0xff]  ;;  %433 = vmatprep.subr.mxu1 %v261_v41  ;;  %v128_v46 = vld [vmem:[#allocation5 + $0x280] sm:$0xff]  ;;  %357 = vmatpush2.msra.mxu0 %v132_v42  ;;  %v94_v22 = vld [vmem:[#allocation5 + $0x170] sm:$0xff] }
  0x53   :  { %v257_v45 = vld [vmem:[#allocation5 + $0x688] sm:$0xff]  ;;  %v256_v47 = vld [vmem:[#allocation5 + $0x680] sm:$0xff]  ;;  %434 = vmatpush2.msra.mxu1 %v260_v43  ;;  %358 = vmatprep.subr.mxu0 %v129_v44  ;;  %v222_v23 = vld [vmem:[#allocation5 + $0x570] sm:$0xff] }
  0x54   :  { %v125_v48 = vld [vmem:[#allocation5 + $0x268] sm:$0xff]  ;;  %435 = vmatprep.subr.mxu1 %v257_v45  ;;  %v124_v50 = vld [vmem:[#allocation5 + $0x260] sm:$0xff]  ;;  %359 = vmatpush2.msra.mxu0 %v128_v46  ;;  %v91_v24 = vld [vmem:[#allocation5 + $0x158] sm:$0xff] }
  0x55   :  { %v253_v49 = vld [vmem:[#allocation5 + $0x668] sm:$0xff]  ;;  %v252_v51 = vld [vmem:[#allocation5 + $0x660] sm:$0xff]  ;;  %436 = vmatpush2.msra.mxu1 %v256_v47  ;;  %360 = vmatprep.subr.mxu0 %v125_v48  ;;  %v219_v25 = vld [vmem:[#allocation5 + $0x558] sm:$0xff] }
  0x56   :  { %v121_v52 = vld [vmem:[#allocation5 + $0x248] sm:$0xff]  ;;  %437 = vmatprep.subr.mxu1 %v253_v49  ;;  %v120_v54 = vld [vmem:[#allocation5 + $0x240] sm:$0xff]  ;;  %361 = vmatpush2.msra.mxu0 %v124_v50  ;;  %v90_v26 = vld [vmem:[#allocation5 + $0x150] sm:$0xff] }
  0x57   :  { %v249_v53 = vld [vmem:[#allocation5 + $0x648] sm:$0xff]  ;;  %v248_v55 = vld [vmem:[#allocation5 + $0x640] sm:$0xff]  ;;  %438 = vmatpush2.msra.mxu1 %v252_v51  ;;  %362 = vmatprep.subr.mxu0 %v121_v52  ;;  %v218_v27 = vld [vmem:[#allocation5 + $0x550] sm:$0xff] }
  0x58   :  { %v117_v56 = vld [vmem:[#allocation5 + $0x228] sm:$0xff]  ;;  %439 = vmatprep.subr.mxu1 %v249_v53  ;;  %v116_v58 = vld [vmem:[#allocation5 + $0x220] sm:$0xff]  ;;  %363 = vmatpush2.msra.mxu0 %v120_v54  ;;  %v87_v28 = vld [vmem:[#allocation5 + $0x138] sm:$0xff] }
  0x59   :  { %v245_v57 = vld [vmem:[#allocation5 + $0x628] sm:$0xff]  ;;  %v244_v59 = vld [vmem:[#allocation5 + $0x620] sm:$0xff]  ;;  %440 = vmatpush2.msra.mxu1 %v248_v55  ;;  %364 = vmatprep.subr.mxu0 %v117_v56  ;;  %v215_v29 = vld [vmem:[#allocation5 + $0x538] sm:$0xff] }
  0x5a   :  { %v113_v60 = vld [vmem:[#allocation5 + $0x208] sm:$0xff]  ;;  %441 = vmatprep.subr.mxu1 %v245_v57  ;;  %v112_v62 = vld [vmem:[#allocation5 + $0x200] sm:$0xff]  ;;  %365 = vmatpush2.msra.mxu0 %v116_v58  ;;  %v86_v30 = vld [vmem:[#allocation5 + $0x130] sm:$0xff] }
  0x5b   :  { %v241_v61 = vld [vmem:[#allocation5 + $0x608] sm:$0xff]  ;;  %442 = vmatpush2.msra.mxu1 %v244_v59  ;;  %v240_v0 = vld [vmem:[#allocation5 + $0x600] sm:$0xff]  ;;  %366 = vmatprep.subr.mxu0 %v113_v60  ;;  %v214_v31 = vld [vmem:[#allocation5 + $0x530] sm:$0xff] }
  0x5c   :  { %v741_v63 = vld [vmem:[#allocation2 + $0x8] sm:$0xff]  ;;  %443 = vmatprep.subr.mxu1 %v241_v61  ;;  %v745_v2 = vld [vmem:[#allocation2] sm:$0xff]  ;;  %367 = vmatpush2.msra.mxu0 %v112_v62  ;;  %v83_v32 = vld [vmem:[#allocation5 + $0x118] sm:$0xff] }
  0x5d   :  { %368 = vmatprep.mubr.f32.mxu0 %v741_v63  ;;  %444 = vmatpush2.msra.mxu1 %v240_v0  ;;  %v211_v33 = vld [vmem:[#allocation5 + $0x518] sm:$0xff]  ;;  %v82_v34 = vld [vmem:[#allocation5 + $0x110] sm:$0xff] }
  0x5e   :  { %445 = vmatprep.mubr.f32.mxu1 %v743_v1  ;;  %369 = vmatmul.mubr.f32.vlgmr.msra.gmra.mxu0 %v745_v2  ;;  %v210_v35 = vld [vmem:[#allocation5 + $0x510] sm:$0xff]  ;;  %v79_v36 = vld [vmem:[#allocation5 + $0xf8] sm:$0xff] }
  0x5f   :  { %446 = vmatmul.mubr.f32.vlgmr.msra.gmra.mxu1 %v747_v3  ;;  %458 = vmatprep.subr.mxu0 %v111_v4  ;;  %v207_v37 = vld [vmem:[#allocation5 + $0x4f8] sm:$0xff]  ;;  %v78_v38 = vld [vmem:[#allocation5 + $0xf0] sm:$0xff] }
  0x60   :  { %535 = vmatprep.subr.mxu1 %v239_v5  ;;  %459 = vmatpush1.msra.mxu0 %v110_v6  ;;  %v206_v39 = vld [vmem:[#allocation5 + $0x4f0] sm:$0xff]  ;;  %v75_v40 = vld [vmem:[#allocation5 + $0xd8] sm:$0xff] }
  0x61   :  { %536 = vmatpush1.msra.mxu1 %v238_v7  ;;  %460 = vmatprep.subr.mxu0 %v107_v8  ;;  %v203_v41 = vld [vmem:[#allocation5 + $0x4d8] sm:$0xff]  ;;  %v74_v42 = vld [vmem:[#allocation5 + $0xd0] sm:$0xff] }
  0x62   :  { %537 = vmatprep.subr.mxu1 %v235_v9  ;;  %461 = vmatpush1.msra.mxu0 %v106_v10  ;;  %v202_v43 = vld [vmem:[#allocation5 + $0x4d0] sm:$0xff]  ;;  %v71_v44 = vld [vmem:[#allocation5 + $0xb8] sm:$0xff] }
  0x63   :  { %538 = vmatpush1.msra.mxu1 %v234_v11  ;;  %462 = vmatprep.subr.mxu0 %v103_v12  ;;  %v199_v45 = vld [vmem:[#allocation5 + $0x4b8] sm:$0xff]  ;;  %v70_v46 = vld [vmem:[#allocation5 + $0xb0] sm:$0xff] }
  0x64   :  { %539 = vmatprep.subr.mxu1 %v231_v13  ;;  %463 = vmatpush1.msra.mxu0 %v102_v14  ;;  %v198_v47 = vld [vmem:[#allocation5 + $0x4b0] sm:$0xff]  ;;  %v67_v48 = vld [vmem:[#allocation5 + $0x98] sm:$0xff] }
  0x65   :  { %540 = vmatpush1.msra.mxu1 %v230_v15  ;;  %464 = vmatprep.subr.mxu0 %v99_v16  ;;  %v195_v49 = vld [vmem:[#allocation5 + $0x498] sm:$0xff]  ;;  %v66_v50 = vld [vmem:[#allocation5 + $0x90] sm:$0xff] }
  0x66   :  { %541 = vmatprep.subr.mxu1 %v227_v17  ;;  %465 = vmatpush1.msra.mxu0 %v98_v18  ;;  %v194_v51 = vld [vmem:[#allocation5 + $0x490] sm:$0xff]  ;;  %v63_v52 = vld [vmem:[#allocation5 + $0x78] sm:$0xff] }
  0x67   :  { %542 = vmatpush1.msra.mxu1 %v226_v19  ;;  %466 = vmatprep.subr.mxu0 %v95_v20  ;;  %v191_v53 = vld [vmem:[#allocation5 + $0x478] sm:$0xff]  ;;  %v62_v54 = vld [vmem:[#allocation5 + $0x70] sm:$0xff] }
  0x68   :  { %543 = vmatprep.subr.mxu1 %v223_v21  ;;  %467 = vmatpush1.msra.mxu0 %v94_v22  ;;  %v190_v55 = vld [vmem:[#allocation5 + $0x470] sm:$0xff]  ;;  %v59_v56 = vld [vmem:[#allocation5 + $0x58] sm:$0xff] }
  0x69   :  { %544 = vmatpush1.msra.mxu1 %v222_v23  ;;  %468 = vmatprep.subr.mxu0 %v91_v24  ;;  %v187_v57 = vld [vmem:[#allocation5 + $0x458] sm:$0xff]  ;;  %v58_v58 = vld [vmem:[#allocation5 + $0x50] sm:$0xff] }
  0x6a   :  { %545 = vmatprep.subr.mxu1 %v219_v25  ;;  %469 = vmatpush1.msra.mxu0 %v90_v26  ;;  %v186_v59 = vld [vmem:[#allocation5 + $0x450] sm:$0xff]  ;;  %v55_v60 = vld [vmem:[#allocation5 + $0x38] sm:$0xff] }
  0x6b   :  { %546 = vmatpush1.msra.mxu1 %v218_v27  ;;  %470 = vmatprep.subr.mxu0 %v87_v28  ;;  %v183_v61 = vld [vmem:[#allocation5 + $0x438] sm:$0xff]  ;;  %v54_v62 = vld [vmem:[#allocation5 + $0x30] sm:$0xff] }
  0x6c   :  { %547 = vmatprep.subr.mxu1 %v215_v29  ;;  %471 = vmatpush1.msra.mxu0 %v86_v30  ;;  %v182_v0 = vld [vmem:[#allocation5 + $0x430] sm:$0xff]  ;;  %v51_v4 = vld [vmem:[#allocation5 + $0x18] sm:$0xff] }
  0x6d   :  { %548 = vmatpush1.msra.mxu1 %v214_v31  ;;  %472 = vmatprep.subr.mxu0 %v83_v32  ;;  %v179_v5 = vld [vmem:[#allocation5 + $0x418] sm:$0xff]  ;;  %v50_v6 = vld [vmem:[#allocation5 + $0x10] sm:$0xff] }
  0x6e   :  { %549 = vmatprep.subr.mxu1 %v211_v33  ;;  %473 = vmatpush1.msra.mxu0 %v82_v34  ;;  %v178_v7 = vld [vmem:[#allocation5 + $0x410] sm:$0xff]  ;;  %v175_v8 = vld [vmem:[#allocation5 + $0x3f8] sm:$0xff] }
  0x6f   :  { %550 = vmatpush1.msra.mxu1 %v210_v35  ;;  %474 = vmatprep.subr.mxu0 %v79_v36  ;;  %v303_v9 = vld [vmem:[#allocation5 + $0x7f8] sm:$0xff]  ;;  %v174_v10 = vld [vmem:[#allocation5 + $0x3f0] sm:$0xff] }
  0x70   :  { %551 = vmatprep.subr.mxu1 %v207_v37  ;;  %475 = vmatpush1.msra.mxu0 %v78_v38  ;;  %v302_v11 = vld [vmem:[#allocation5 + $0x7f0] sm:$0xff]  ;;  %v171_v12 = vld [vmem:[#allocation5 + $0x3d8] sm:$0xff] }
  0x71   :  { %552 = vmatpush1.msra.mxu1 %v206_v39  ;;  %476 = vmatprep.subr.mxu0 %v75_v40  ;;  %v299_v13 = vld [vmem:[#allocation5 + $0x7d8] sm:$0xff]  ;;  %v170_v14 = vld [vmem:[#allocation5 + $0x3d0] sm:$0xff] }
  0x72   :  { %553 = vmatprep.subr.mxu1 %v203_v41  ;;  %477 = vmatpush1.msra.mxu0 %v74_v42  ;;  %v298_v15 = vld [vmem:[#allocation5 + $0x7d0] sm:$0xff]  ;;  %v167_v16 = vld [vmem:[#allocation5 + $0x3b8] sm:$0xff] }
  0x73   :  { %554 = vmatpush1.msra.mxu1 %v202_v43  ;;  %478 = vmatprep.subr.mxu0 %v71_v44  ;;  %v295_v17 = vld [vmem:[#allocation5 + $0x7b8] sm:$0xff]  ;;  %v166_v18 = vld [vmem:[#allocation5 + $0x3b0] sm:$0xff] }
  0x74   :  { %555 = vmatprep.subr.mxu1 %v199_v45  ;;  %479 = vmatpush1.msra.mxu0 %v70_v46  ;;  %v294_v19 = vld [vmem:[#allocation5 + $0x7b0] sm:$0xff]  ;;  %v163_v20 = vld [vmem:[#allocation5 + $0x398] sm:$0xff] }
  0x75   :  { %556 = vmatpush1.msra.mxu1 %v198_v47  ;;  %480 = vmatprep.subr.mxu0 %v67_v48  ;;  %v291_v21 = vld [vmem:[#allocation5 + $0x798] sm:$0xff]  ;;  %v162_v22 = vld [vmem:[#allocation5 + $0x390] sm:$0xff] }
  0x76   :  { %557 = vmatprep.subr.mxu1 %v195_v49  ;;  %481 = vmatpush1.msra.mxu0 %v66_v50  ;;  %v290_v23 = vld [vmem:[#allocation5 + $0x790] sm:$0xff]  ;;  %v159_v24 = vld [vmem:[#allocation5 + $0x378] sm:$0xff] }
  0x77   :  { %558 = vmatpush1.msra.mxu1 %v194_v51  ;;  %482 = vmatprep.subr.mxu0 %v63_v52  ;;  %v287_v25 = vld [vmem:[#allocation5 + $0x778] sm:$0xff]  ;;  %v158_v26 = vld [vmem:[#allocation5 + $0x370] sm:$0xff] }
  0x78   :  { %559 = vmatprep.subr.mxu1 %v191_v53  ;;  %483 = vmatpush1.msra.mxu0 %v62_v54  ;;  %v286_v27 = vld [vmem:[#allocation5 + $0x770] sm:$0xff]  ;;  %v155_v28 = vld [vmem:[#allocation5 + $0x358] sm:$0xff] }
  0x79   :  { %560 = vmatpush1.msra.mxu1 %v190_v55  ;;  %484 = vmatprep.subr.mxu0 %v59_v56  ;;  %v283_v29 = vld [vmem:[#allocation5 + $0x758] sm:$0xff]  ;;  %v154_v30 = vld [vmem:[#allocation5 + $0x350] sm:$0xff] }
  0x7a   :  { %561 = vmatprep.subr.mxu1 %v187_v57  ;;  %485 = vmatpush1.msra.mxu0 %v58_v58  ;;  %v282_v31 = vld [vmem:[#allocation5 + $0x750] sm:$0xff]  ;;  %v151_v32 = vld [vmem:[#allocation5 + $0x338] sm:$0xff]  ;;  %v45_v58 = vld [vmem:[#allocation2 + $0x28] sm:$0xff] }
  0x7b   :  { %562 = vmatpush1.msra.mxu1 %v186_v59  ;;  %486 = vmatprep.subr.mxu0 %v55_v60  ;;  %v279_v33 = vld [vmem:[#allocation5 + $0x738] sm:$0xff]  ;;  %v150_v34 = vld [vmem:[#allocation5 + $0x330] sm:$0xff] }
  0x7c   :  { %563 = vmatprep.subr.mxu1 %v183_v61  ;;  %487 = vmatpush1.msra.mxu0 %v54_v62  ;;  %v278_v35 = vld [vmem:[#allocation5 + $0x730] sm:$0xff]  ;;  %v147_v36 = vld [vmem:[#allocation5 + $0x318] sm:$0xff]  ;;  %v44_v62 = vld [vmem:[#allocation2 + $0x20] sm:$0xff] }
  0x7d   :  { %564 = vmatpush1.msra.mxu1 %v182_v0  ;;  %488 = vmatprep.subr.mxu0 %v51_v4  ;;  %v275_v37 = vld [vmem:[#allocation5 + $0x718] sm:$0xff]  ;;  %v146_v38 = vld [vmem:[#allocation5 + $0x310] sm:$0xff] }
  0x7e   :  { %565 = vmatprep.subr.mxu1 %v179_v5  ;;  %489 = vmatpush1.msra.mxu0 %v50_v6  ;;  %v274_v39 = vld [vmem:[#allocation5 + $0x710] sm:$0xff]  ;;  %v143_v40 = vld [vmem:[#allocation5 + $0x2f8] sm:$0xff] }
  0x7f   :  { %566 = vmatpush1.msra.mxu1 %v178_v7  ;;  %490 = vmatprep.subr.mxu0 %v175_v8  ;;  %v271_v41 = vld [vmem:[#allocation5 + $0x6f8] sm:$0xff]  ;;  %v142_v42 = vld [vmem:[#allocation5 + $0x2f0] sm:$0xff] }
  0x80   :  { %567 = vmatprep.subr.mxu1 %v303_v9  ;;  %491 = vmatpush2.msra.mxu0 %v174_v10  ;;  %v270_v43 = vld [vmem:[#allocation5 + $0x6f0] sm:$0xff]  ;;  %v139_v44 = vld [vmem:[#allocation5 + $0x2d8] sm:$0xff] }
  0x81   :  { %568 = vmatpush2.msra.mxu1 %v302_v11  ;;  %492 = vmatprep.subr.mxu0 %v171_v12  ;;  %v267_v45 = vld [vmem:[#allocation5 + $0x6d8] sm:$0xff]  ;;  %v138_v46 = vld [vmem:[#allocation5 + $0x2d0] sm:$0xff] }
  0x82   :  { %569 = vmatprep.subr.mxu1 %v299_v13  ;;  %493 = vmatpush2.msra.mxu0 %v170_v14  ;;  %v266_v47 = vld [vmem:[#allocation5 + $0x6d0] sm:$0xff]  ;;  %v135_v48 = vld [vmem:[#allocation5 + $0x2b8] sm:$0xff] }
  0x83   :  { %570 = vmatpush2.msra.mxu1 %v298_v15  ;;  %494 = vmatprep.subr.mxu0 %v167_v16  ;;  %v263_v49 = vld [vmem:[#allocation5 + $0x6b8] sm:$0xff]  ;;  %v134_v50 = vld [vmem:[#allocation5 + $0x2b0] sm:$0xff] }
  0x84   :  { %571 = vmatprep.subr.mxu1 %v295_v17  ;;  %495 = vmatpush2.msra.mxu0 %v166_v18  ;;  %v262_v51 = vld [vmem:[#allocation5 + $0x6b0] sm:$0xff]  ;;  %v131_v52 = vld [vmem:[#allocation5 + $0x298] sm:$0xff] }
  0x85   :  { %572 = vmatpush2.msra.mxu1 %v294_v19  ;;  %496 = vmatprep.subr.mxu0 %v163_v20  ;;  %v259_v53 = vld [vmem:[#allocation5 + $0x698] sm:$0xff]  ;;  %v130_v54 = vld [vmem:[#allocation5 + $0x290] sm:$0xff] }
  0x86   :  { %573 = vmatprep.subr.mxu1 %v291_v21  ;;  %497 = vmatpush2.msra.mxu0 %v162_v22  ;;  %v258_v55 = vld [vmem:[#allocation5 + $0x690] sm:$0xff]  ;;  %v127_v56 = vld [vmem:[#allocation5 + $0x278] sm:$0xff] }
  0x87   :  { %574 = vmatpush2.msra.mxu1 %v290_v23  ;;  %498 = vmatprep.subr.mxu0 %v159_v24  ;;  %v255_v57 = vld [vmem:[#allocation5 + $0x678] sm:$0xff]  ;;  %v126_v60 = vld [vmem:[#allocation5 + $0x270] sm:$0xff] }
  0x88   :  { %575 = vmatprep.subr.mxu1 %v287_v25  ;;  %499 = vmatpush2.msra.mxu0 %v158_v26  ;;  %v47_v59 = vld [vmem:[#allocation2 + $0x38] sm:$0xff]  ;;  %v254_v61 = vld [vmem:[#allocation5 + $0x670] sm:$0xff] }
  0x89   :  { %576 = vmatpush2.msra.mxu1 %v286_v27  ;;  %500 = vmatprep.subr.mxu0 %v155_v28  ;;  %v46_v0 = vld [vmem:[#allocation2 + $0x30] sm:$0xff]  ;;  %v123_v4 = vld [vmem:[#allocation5 + $0x258] sm:$0xff] }
  0x8a   :  { %577 = vmatprep.subr.mxu1 %v283_v29  ;;  %501 = vmatpush2.msra.mxu0 %v154_v30  ;;  %v251_v5 = vld [vmem:[#allocation5 + $0x658] sm:$0xff]  ;;  %v122_v6 = vld [vmem:[#allocation5 + $0x250] sm:$0xff] }
  0x8b   :  { %578 = vmatpush2.msra.mxu1 %v282_v31  ;;  %502 = vmatprep.subr.mxu0 %v151_v32  ;;  %v250_v7 = vld [vmem:[#allocation5 + $0x650] sm:$0xff]  ;;  %v119_v8 = vld [vmem:[#allocation5 + $0x238] sm:$0xff] }
  0x8c   :  { %579 = vmatprep.subr.mxu1 %v279_v33  ;;  %503 = vmatpush2.msra.mxu0 %v150_v34  ;;  %v247_v9 = vld [vmem:[#allocation5 + $0x638] sm:$0xff]  ;;  %v118_v10 = vld [vmem:[#allocation5 + $0x230] sm:$0xff] }
  0x8d   :  { %580 = vmatpush2.msra.mxu1 %v278_v35  ;;  %504 = vmatprep.subr.mxu0 %v147_v36  ;;  %v246_v11 = vld [vmem:[#allocation5 + $0x630] sm:$0xff]  ;;  %v115_v12 = vld [vmem:[#allocation5 + $0x218] sm:$0xff] }
  0x8e   :  { %581 = vmatprep.subr.mxu1 %v275_v37  ;;  %505 = vmatpush2.msra.mxu0 %v146_v38  ;;  %v243_v13 = vld [vmem:[#allocation5 + $0x618] sm:$0xff]  ;;  %v114_v14 = vld [vmem:[#allocation5 + $0x210] sm:$0xff] }
  0x8f   :  { %582 = vmatpush2.msra.mxu1 %v274_v39  ;;  %506 = vmatprep.subr.mxu0 %v143_v40  ;;  %v242_v15 = vld [vmem:[#allocation5 + $0x610] sm:$0xff] }
  0x90   :  { %583 = vmatprep.subr.mxu1 %v271_v41  ;;  %507 = vmatpush2.msra.mxu0 %v142_v42 }
  0x91   :  { %584 = vmatpush2.msra.mxu1 %v270_v43  ;;  %508 = vmatprep.subr.mxu0 %v139_v44 }
  0x92   :  { %585 = vmatprep.subr.mxu1 %v267_v45  ;;  %509 = vmatpush2.msra.mxu0 %v138_v46 }
  0x93   :  { %586 = vmatpush2.msra.mxu1 %v266_v47  ;;  %510 = vmatprep.subr.mxu0 %v135_v48 }
  0x94   :  { %587 = vmatprep.subr.mxu1 %v263_v49  ;;  %511 = vmatpush2.msra.mxu0 %v134_v50 }
  0x95   :  { %588 = vmatpush2.msra.mxu1 %v262_v51  ;;  %512 = vmatprep.subr.mxu0 %v131_v52 }
  0x96   :  { %589 = vmatprep.subr.mxu1 %v259_v53  ;;  %513 = vmatpush2.msra.mxu0 %v130_v54 }
  0x97   :  { %590 = vmatpush2.msra.mxu1 %v258_v55  ;;  %514 = vmatprep.subr.mxu0 %v127_v56 }
  0x98   :  { %591 = vmatprep.subr.mxu1 %v255_v57  ;;  %374 = vmatprep.mubr.f32.mxu0 %v45_v58 }
  0x99   :  { %451 = vmatprep.mubr.f32.mxu1 %v47_v59  ;;  %515 = vmatpush2.msra.mxu0 %v126_v60 }
  0x9a   :  { %592 = vmatpush2.msra.mxu1 %v254_v61  ;;  %375 = vmatmul.mubr.f32.gmra.mxu0 %v44_v62 }
  0x9b   :  { %452 = vmatmul.mubr.f32.gmra.mxu1 %v46_v0  ;;  %516 = vmatprep.subr.mxu0 %v123_v4 }
  0x9c   :  { %593 = vmatprep.subr.mxu1 %v251_v5  ;;  %517 = vmatpush2.msra.mxu0 %v122_v6 }
  0x9d   :  { %594 = vmatpush2.msra.mxu1 %v250_v7  ;;  %518 = vmatprep.subr.mxu0 %v119_v8 }
  0x9e   :  { %595 = vmatprep.subr.mxu1 %v247_v9  ;;  %519 = vmatpush2.msra.mxu0 %v118_v10 }
  0x9f   :  { %596 = vmatpush2.msra.mxu1 %v246_v11  ;;  %520 = vmatprep.subr.mxu0 %v115_v12 }
  0xa0   :  { %597 = vmatprep.subr.mxu1 %v243_v13  ;;  %521 = vmatpush2.msra.mxu0 %v114_v14 }
  0xa1   :  { %522 = vmatprep.mubr.f32.mxu0 %v741_v63  ;;  %598 = vmatpush2.msra.mxu1 %v242_v15 }
  0xa2   :  { %599 = vmatprep.mubr.f32.mxu1 %v743_v1  ;;  %523 = vmatmul.mubr.f32.vlgmr.msra.gmra.mxu0 %v745_v2 }
  0xa3   :  { %600 = vmatmul.mubr.f32.vlgmr.msra.gmra.mxu1 %v747_v3  ;;  %528 = vmatprep.mubr.f32.mxu0 %v45_v58 }
  0xa4   :  { %605 = vmatprep.mubr.f32.mxu1 %v47_v59 }
  0xa6   :  { %529 = vmatmul.mubr.f32.gmra.mxu0 %v44_v62 }
  0xa7   :  { %606 = vmatmul.mubr.f32.gmra.mxu1 %v46_v0 }
 0x11e   :  { %v370_v16 = vpop.f32.mrf.mxu0 }
 0x11f   :  { %v447_v17 = vpop.f32.mrf.mxu1 }
 0x120   :  { %v448_v18 = vadd.f32 %v447_v17, %v370_v16  ;;  %v372_v19 = vpop.f32.mrf.mxu0 }
 0x121   :  { %v449_v20 = vpop.f32.mrf.mxu1 }
 0x122   :  { %612 = vst [vmem:[#allocation7] sm:$0xff] %v448_v18  ;;  %v450_v21 = vadd.f32 %v449_v20, %v372_v19 }
 0x124   :  { %613 = vst [vmem:[#allocation7 + $0x8] sm:$0xff] %v450_v21 }
 0x15a   :  { %v376_v63 = vpop.f32.mrf.mxu0 }
 0x15b   :  { %v453_v22 = vpop.f32.mrf.mxu1 }
 0x15c   :  { %v454_v23 = vadd.f32 %v453_v22, %v376_v63  ;;  %v378_v1 = vpop.f32.mrf.mxu0 }
 0x15d   :  { %v455_v24 = vpop.f32.mrf.mxu1 }
 0x15e   :  { %616 = vst [vmem:[#allocation7 + $0x20] sm:$0xff] %v454_v23  ;;  %v456_v2 = vadd.f32 %v455_v24, %v378_v1 }
 0x160   :  { %617 = vst [vmem:[#allocation7 + $0x28] sm:$0xff] %v456_v2 }
 0x162   :  { %v524_v3 = vpop.f32.mrf.mxu0 }
 0x163   :  { %v601_v25 = vpop.f32.mrf.mxu1 }
 0x164   :  { %v602_v26 = vadd.f32 %v601_v25, %v524_v3  ;;  %v526_v27 = vpop.f32.mrf.mxu0 }
 0x165   :  { %v603_v28 = vpop.f32.mrf.mxu1 }
 0x166   :  { %614 = vst [vmem:[#allocation7 + $0x10] sm:$0xff] %v602_v26  ;;  %v604_v29 = vadd.f32 %v603_v28, %v526_v27  ;;  %v530_v30 = vpop.f32.mrf.mxu0 }
 0x167   :  { %v607_v31 = vpop.f32.mrf.mxu1 }
 0x168   :  { %615 = vst [vmem:[#allocation7 + $0x18] sm:$0xff] %v604_v29  ;;  %v608_v32 = vadd.f32 %v607_v31, %v530_v30  ;;  %v532_v33 = vpop.f32.mrf.mxu0 }
 0x169   :  { %v609_v34 = vpop.f32.mrf.mxu1 }
 0x16a   :  { %618 = vst [vmem:[#allocation7 + $0x30] sm:$0xff] %v608_v32  ;;  %v610_v35 = vadd.f32 %v609_v34, %v532_v33 }
 0x16c   :  { %619 = vst [vmem:[#allocation7 + $0x38] sm:$0xff] %v610_v35 }
 0x16d   :  { %694 = shalt.err (!%p691_p0)
}
 0x16e   :  { %631 = dma.vmem_to_hbm [thread:$0]  %s626_s1, 1024, %s765_s2, [#allocation4], %s710_s12, %s710_s12, %s711_s13  }
 0x16f   :  { %707 = dma.done.wait [#allocation4], 1024  }
 0x170   :  { %708 = vsyncadd [#allocation4], 4294966272 }
 0x171   :  { %635 = vsyncpa [#allocation3], 1 }
 0x172   :  { %636 = vsyncpa [#allocation6], 1 }
 0x173   :  { %637 = vsyncpa [#allocation4], 1 }

</bundles_post_ra>
